<compile_context>
chip_gen: v7x
topology: tpu7x:2x2x1
jax: 0.10.0
libtpu: 0.0.40
codegen_flags: <defaults>
</compile_context>

<pallas_src>
import jax
import jax.numpy as jnp
from jax import lax
from jax.experimental import pallas as pl
from jax.experimental.pallas import tpu as pltpu


def _infonce_kernel(asm_ref, src_ref, loss_ref, sim_ref, src_n_ref):
    i = pl.program_id(0)
    tm = asm_ref.shape[0]          # rows in this tile
    b_total = src_ref.shape[0]     # full batch size
    eps_sq = jnp.float32(1e-24)    # (F.normalize eps = 1e-12) ** 2

    # Once per kernel: sanitize + L2-normalize the full src block into VMEM
    # scratch so it is not recomputed for every row tile; zero the loss acc.
    @pl.when(i == 0)
    def _():
        src = src_ref[...].astype(jnp.float32)
        src = jnp.where(jnp.isfinite(src), src, 0.0)            # nan/inf -> 0
        ss = jnp.sum(src * src, axis=1, keepdims=True)
        # x / max(||x||, eps) == x * rsqrt(max(||x||^2, eps^2))  (EUP, no vdiv)
        src_n_ref[...] = src * lax.rsqrt(jnp.maximum(ss, eps_sq))
        loss_ref[0, 0] = jnp.float32(0.0)

    # Per row tile: sanitize + normalize asm rows.
    asm = asm_ref[...].astype(jnp.float32)
    asm = jnp.where(jnp.isfinite(asm), asm, 0.0)                 # nan/inf -> 0
    ss = jnp.sum(asm * asm, axis=1, keepdims=True)
    asm_n = asm * lax.rsqrt(jnp.maximum(ss, eps_sq))

    src_n = src_n_ref[...]

    # sim tile = asm_n @ src_n.T, contracted on dim 1 of both operands so the
    # RHS transpose is never materialized.
    # NOTE(v6e/v7x): casting asm_n/src_n to bf16 here gives ~4x MXU throughput
    # at large B (sim accuracy ~1e-3); kept f32 to preserve 1e-5 parity.
    sim = lax.dot_general(
        asm_n, src_n,
        dimension_numbers=(((1,), (1,)), ((), ())),
        preferred_element_type=jnp.float32)
    sim_ref[...] = sim

    # Diagonal entries sim[r, r] of this tile == row-wise dot of asm_n with
    # the matching src rows (one (tm, D) multiply + reduce, no iota masking).
    row0 = pl.multiple_of(i * tm, tm)
    src_match = src_n_ref[pl.ds(row0, tm), :]
    diag = jnp.sum(asm_n * src_match, axis=1, keepdims=True)     # (tm, 1)

    # Stable log-sum-exp over all B columns for this row tile.
    m = jnp.max(sim, axis=1, keepdims=True)
    lse = m + jnp.log(jnp.sum(jnp.exp(sim - m), axis=1, keepdims=True))

    # cross_entropy with labels = arange(B): per-row loss = lse_r - sim[r, r].
    loss_ref[0, 0] += jnp.sum(lse - diag)

    @pl.when(i == pl.num_programs(0) - 1)
    def _():
        loss_ref[0, 0] = loss_ref[0, 0] * jnp.float32(1.0 / b_total)


def _pick_row_tile(b):
    """Largest 8-aligned row tile <= 256 that divides B; else the full B."""
    for t in (256, 128, 64, 32, 16, 8):
        if b % t == 0:
            return t
    return b


def infonce_loss(asm_emb, src_emb):
    """Pallas implementation of InfoNCELoss.forward. Returns (loss, sim)."""
    assert asm_emb.ndim == 2 and src_emb.ndim == 2, "expected 2-D embeddings"
    assert asm_emb.shape == src_emb.shape, "expected matching (B, D) shapes"
    B, D = asm_emb.shape
    tm = _pick_row_tile(B)
    n_row_tiles = B // tm

    loss, sim = pl.pallas_call(
        _infonce_kernel,
        out_shape=(
            jax.ShapeDtypeStruct((1, 1), jnp.float32),   # scalar loss
            jax.ShapeDtypeStruct((B, B), jnp.float32),   # similarity matrix
        ),
        grid_spec=pltpu.PrefetchScalarGridSpec(
            num_scalar_prefetch=0,
            grid=(n_row_tiles,),
            in_specs=[
                # asm: one (tm, D) row tile per grid step (auto-pipelined).
                pl.BlockSpec((tm, D), lambda i: (i, 0)),
                # src: full (B, D), same block every step -> loaded once,
                # stays resident in VMEM.
                pl.BlockSpec((B, D), lambda i: (0, 0)),
            ],
            out_specs=(
                # Scalar loss accumulates in SMEM across grid steps.
                pl.BlockSpec(memory_space=pltpu.MemorySpace.SMEM),
                # Similarity row tile, full column range (lane width = B).
                pl.BlockSpec((tm, B), lambda i: (i, 0)),
            ),
            scratch_shapes=[
                # Normalized src, computed once at grid step 0 and reused.
                pltpu.VMEM((B, D), jnp.float32),
            ],
        ),
        # The row axis also carries the serial loss accumulation -> arbitrary.
        compiler_params=pltpu.CompilerParams(
            dimension_semantics=("arbitrary",)),
    )(asm_emb, src_emb)
    return loss[0, 0], sim


def _reference(asm_emb, src_emb):
    asm = jnp.where(jnp.isfinite(asm_emb), asm_emb, 0.0).astype(jnp.float32)
    src = jnp.where(jnp.isfinite(src_emb), src_emb, 0.0).astype(jnp.float32)
    asm_n = asm / jnp.maximum(jnp.linalg.norm(asm, axis=1, keepdims=True), 1e-12)
    src_n = src / jnp.maximum(jnp.linalg.norm(src, axis=1, keepdims=True), 1e-12)
    sim = asm_n @ src_n.T
    lse = jax.scipy.special.logsumexp(sim, axis=1)
    loss = jnp.mean(lse - jnp.diag(sim))
    return loss, sim


if __name__ == "__main__":
    key = jax.random.PRNGKey(0)
    k1, k2 = jax.random.split(key)
    B, D = 8, 128
    asm_emb = jax.random.normal(k1, (B, D), dtype=jnp.float32)
    src_emb = jax.random.normal(k2, (B, D), dtype=jnp.float32)

    loss, sim = infonce_loss(asm_emb, src_emb)
    jax.block_until_ready((loss, sim))

    ref_loss, ref_sim = _reference(asm_emb, src_emb)
    assert jnp.allclose(sim, ref_sim, atol=1e-5), "similarity mismatch"
    assert jnp.allclose(loss, ref_loss, atol=1e-5), "loss mismatch"

    print("KERNEL_OK")
</pallas_src>

<mosaic_0001>
module attributes {stable_mosaic.version = 11 : i64} {
  func.func @_infonce_kernel(%arg0: i32, %arg1: memref<8x128xf32, #tpu.memory_space<vmem>>, %arg2: memref<8x128xf32, #tpu.memory_space<vmem>>, %arg3: memref<1x1xf32, #tpu.memory_space<smem>>, %arg4: memref<8x8xf32, #tpu.memory_space<vmem>>, %arg5: memref<8x128xf32, #tpu.memory_space<vmem>>) attributes {dimension_semantics = [#tpu.dimension_semantics<arbitrary>], iteration_bounds = array<i64: 1>, scalar_prefetch = 0 : i64, scratch_operands = 1 : i64, tpu.core_type = #tpu.core_type<tc>, window_params = [{transform_indices = @transform_0, window_bounds = array<i64: 8, 128>}, {pipeline_mode = #tpu.pipeline_mode<synchronous>, transform_indices = @transform_1, window_bounds = array<i64: 8, 128>}, {transform_indices = @transform_2, window_bounds = array<i64: 1, 1>}, {transform_indices = @transform_3, window_bounds = array<i64: 8, 8>}]} {
    %c0_i32 = arith.constant 0 : i32
    %0 = arith.cmpi eq, %arg0, %c0_i32 : i32
    %1 = arith.extui %0 : i1 to i32
    %cst = arith.constant 1.000000e-24 : f32
    %c0_i32_0 = arith.constant 0 : i32
    %2 = arith.cmpi ne, %1, %c0_i32_0 : i32
    scf.if %2 {
      %c0_22 = arith.constant 0 : index
      %c0_23 = arith.constant 0 : index
      %46 = vector.load %arg2[%c0_22, %c0_23] : memref<8x128xf32, #tpu.memory_space<vmem>>, vector<8x128xf32>
      %47 = tpu.weird %46 : vector<8x128xf32> -> vector<8x128xi1>
      %cst_24 = arith.constant dense<true> : vector<8x128xi1>
      %48 = arith.xori %47, %cst_24 : vector<8x128xi1>
      %cst_25 = arith.constant 0.000000e+00 : f32
      %49 = vector.broadcast %cst_25 : f32 to vector<8x128xf32>
      %50 = arith.select %48, %46, %49 : vector<8x128xi1>, vector<8x128xf32>
      %51 = arith.mulf %50, %50 : vector<8x128xf32>
      %cst_26 = arith.constant dense<0.000000e+00> : vector<8xf32>
      %52 = vector.multi_reduction <add>, %51, %cst_26 [1] : vector<8x128xf32> to vector<8xf32>
      %53 = vector.shape_cast %52 : vector<8xf32> to vector<8x1xf32>
      %54 = vector.broadcast %cst : f32 to vector<8x1xf32>
      %55 = arith.maximumf %53, %54 : vector<8x1xf32>
      %56 = math.rsqrt %55 : vector<8x1xf32>
      %57 = vector.broadcast %56 : vector<8x1xf32> to vector<8x128xf32>
      %58 = arith.mulf %50, %57 : vector<8x128xf32>
      %c0_27 = arith.constant 0 : index
      %c0_28 = arith.constant 0 : index
      %59 = vector.load %arg5[%c0_27, %c0_28] : memref<8x128xf32, #tpu.memory_space<vmem>>, vector<8x128xf32>
      tpu.vector_store %arg5[%c0_27, %c0_28], %58 {strides = array<i32>} : memref<8x128xf32, #tpu.memory_space<vmem>>, vector<8x128xf32>,
      %cst_29 = arith.constant 0.000000e+00 : f32
      %c0_30 = arith.constant 0 : index
      %c0_31 = arith.constant 0 : index
      %60 = memref.load %arg3[%c0_30, %c0_31] : memref<1x1xf32, #tpu.memory_space<smem>>
      memref.store %cst_29, %arg3[%c0_30, %c0_31] : memref<1x1xf32, #tpu.memory_space<smem>>
    } else {
    }
    %c0 = arith.constant 0 : index
    %c0_1 = arith.constant 0 : index
    %3 = vector.load %arg1[%c0, %c0_1] : memref<8x128xf32, #tpu.memory_space<vmem>>, vector<8x128xf32>
    %4 = tpu.weird %3 : vector<8x128xf32> -> vector<8x128xi1>
    %cst_2 = arith.constant dense<true> : vector<8x128xi1>
    %5 = arith.xori %4, %cst_2 : vector<8x128xi1>
    %cst_3 = arith.constant 0.000000e+00 : f32
    %6 = vector.broadcast %cst_3 : f32 to vector<8x128xf32>
    %7 = arith.select %5, %3, %6 : vector<8x128xi1>, vector<8x128xf32>
    %8 = arith.mulf %7, %7 : vector<8x128xf32>
    %cst_4 = arith.constant dense<0.000000e+00> : vector<8xf32>
    %9 = vector.multi_reduction <add>, %8, %cst_4 [1] : vector<8x128xf32> to vector<8xf32>
    %10 = vector.shape_cast %9 : vector<8xf32> to vector<8x1xf32>
    %cst_5 = arith.constant 1.000000e-24 : f32
    %11 = vector.broadcast %cst_5 : f32 to vector<8x1xf32>
    %12 = arith.maximumf %10, %11 : vector<8x1xf32>
    %13 = math.rsqrt %12 : vector<8x1xf32>
    %14 = vector.broadcast %13 : vector<8x1xf32> to vector<8x128xf32>
    %15 = arith.mulf %7, %14 : vector<8x128xf32>
    %c0_6 = arith.constant 0 : index
    %c0_7 = arith.constant 0 : index
    %16 = vector.load %arg5[%c0_6, %c0_7] : memref<8x128xf32, #tpu.memory_space<vmem>>, vector<8x128xf32>
    %cst_8 = arith.constant dense<0.000000e+00> : vector<8x8xf32>
    %17 = tpu.matmul %15, %16, %cst_8 {dimension_numbers = #tpu.dot_dimension_numbers<[1], [1], [0], [0], [0, 0, 1, 0], [], []>} : vector<8x128xf32>, vector<8x128xf32>, vector<8x8xf32> -> vector<8x8xf32>
    %c0_9 = arith.constant 0 : index
    %c0_10 = arith.constant 0 : index
    %18 = vector.load %arg4[%c0_9, %c0_10] : memref<8x8xf32, #tpu.memory_space<vmem>>, vector<8x8xf32>
    tpu.vector_store %arg4[%c0_9, %c0_10], %17 {strides = array<i32>} : memref<8x8xf32, #tpu.memory_space<vmem>>, vector<8x8xf32>,
    %c8_i32 = arith.constant 8 : i32
    %19 = arith.muli %arg0, %c8_i32 : i32
    %20 = tpu.assume_multiple %19, 8 : i32
    %21 = arith.index_cast %20 : i32 to index
    %c0_11 = arith.constant 0 : index
    %22 = vector.load %arg5[%21, %c0_11] : memref<8x128xf32, #tpu.memory_space<vmem>>, vector<8x128xf32>
    %23 = arith.mulf %15, %22 : vector<8x128xf32>
    %cst_12 = arith.constant dense<0.000000e+00> : vector<8xf32>
    %24 = vector.multi_reduction <add>, %23, %cst_12 [1] : vector<8x128xf32> to vector<8xf32>
    %25 = vector.shape_cast %24 : vector<8xf32> to vector<8x1xf32>
    %cst_13 = arith.constant dense<0xFF800000> : vector<8xf32>
    %26 = vector.multi_reduction <maximumf>, %17, %cst_13 [1] : vector<8x8xf32> to vector<8xf32>
    %27 = vector.shape_cast %26 : vector<8xf32> to vector<8x1xf32>
    %28 = vector.broadcast %27 : vector<8x1xf32> to vector<8x8xf32>
    %29 = arith.subf %17, %28 : vector<8x8xf32>
    %30 = math.exp %29 : vector<8x8xf32>
    %cst_14 = arith.constant dense<0.000000e+00> : vector<8xf32>
    %31 = vector.multi_reduction <add>, %30, %cst_14 [1] : vector<8x8xf32> to vector<8xf32>
    %32 = vector.shape_cast %31 : vector<8xf32> to vector<8x1xf32>
    %33 = math.log %32 : vector<8x1xf32>
    %34 = arith.addf %27, %33 : vector<8x1xf32>
    %c0_15 = arith.constant 0 : index
    %c0_16 = arith.constant 0 : index
    %35 = memref.load %arg3[%c0_15, %c0_16] : memref<1x1xf32, #tpu.memory_space<smem>>
    %36 = arith.subf %34, %25 : vector<8x1xf32>
    %37 = vector.shape_cast %36 : vector<8x1xf32> to vector<1x8x1xf32>
    %cst_17 = arith.constant dense<0.000000e+00> : vector<1xf32>
    %38 = vector.multi_reduction <add>, %37, %cst_17 [1, 2] : vector<1x8x1xf32> to vector<1xf32>
    %39 = vector.shape_cast %38 : vector<1xf32> to vector<1x1x1xf32>
    %40 = vector.extract %39[0, 0, 0] : f32 from vector<1x1x1xf32>
    %41 = arith.addf %35, %40 : f32
    %c0_18 = arith.constant 0 : index
    %c0_19 = arith.constant 0 : index
    %42 = memref.load %arg3[%c0_18, %c0_19] : memref<1x1xf32, #tpu.memory_space<smem>>
    memref.store %41, %arg3[%c0_18, %c0_19] : memref<1x1xf32, #tpu.memory_space<smem>>
    %c0_i32_20 = arith.constant 0 : i32
    %43 = arith.cmpi eq, %arg0, %c0_i32_20 : i32
    %44 = arith.extui %43 : i1 to i32
    %c0_i32_21 = arith.constant 0 : i32
    %45 = arith.cmpi ne, %44, %c0_i32_21 : i32
    scf.if %45 {
      %c0_22 = arith.constant 0 : index
      %c0_23 = arith.constant 0 : index
      %46 = memref.load %arg3[%c0_22, %c0_23] : memref<1x1xf32, #tpu.memory_space<smem>>
      %cst_24 = arith.constant 1.250000e-01 : f32
      %47 = arith.mulf %46, %cst_24 : f32
      %c0_25 = arith.constant 0 : index
      %c0_26 = arith.constant 0 : index
      %48 = memref.load %arg3[%c0_25, %c0_26] : memref<1x1xf32, #tpu.memory_space<smem>>
      memref.store %47, %arg3[%c0_25, %c0_26] : memref<1x1xf32, #tpu.memory_space<smem>>
    } else {
    }
    return
  }
  func.func @transform_0(%arg0: i32) -> (i32, i32) {
    %c0_i32 = arith.constant 0 : i32
    %c0_i32_0 = arith.constant 0 : i32
    return %arg0, %c0_i32 : i32, i32
  }
  func.func @transform_1(%arg0: i32) -> (i32, i32) {
    %c0_i32 = arith.constant 0 : i32
    %c0_i32_0 = arith.constant 0 : i32
    %c0_i32_1 = arith.constant 0 : i32
    return %c0_i32, %c0_i32_0 : i32, i32
  }
  func.func @transform_2(%arg0: i32) -> (i32, i32) {
    %c0_i32 = arith.constant 0 : i32
    %c0_i32_0 = arith.constant 0 : i32
    %c0_i32_1 = arith.constant 0 : i32
    return %c0_i32, %c0_i32_0 : i32, i32
  }
  func.func @transform_3(%arg0: i32) -> (i32, i32) {
    %c0_i32 = arith.constant 0 : i32
    %c0_i32_0 = arith.constant 0 : i32
    return %arg0, %c0_i32 : i32, i32
  }
}

</mosaic_0001>

<bundles_post_ra>
// kernel: tpu_custom_call.1
= control target key start
LH: loop header
LB: loop body
LE: loop exit
PB: predicated region body
PF: predicated region fallthrough
CT: control target
= control target key end

     0   :  { %9 = vsyncpa [#allocation4], 0  ;;  %s392_s0 = inlined_call_operand.hbm [shape: f32[8,128], index: 0, kind: input, shape index: {}]   ;;  %s393_s1 = inlined_call_operand.hbm [shape: f32[8,128], index: 1, kind: input, shape index: {}]   ;;  %s394_s2 = inlined_call_operand.hbm [shape: f32[1,1], index: 2, kind: output, shape index: {0}]   ;;  %s395_s3 = inlined_call_operand.hbm [shape: f32[8,8], index: 3, kind: output, shape index: {1}]  }
   0x1   :  { %10 = vsyncpa [#allocation8], 0 }
   0x2   :  { %11 = vsyncpa [#allocation6], 0 }
   0x3   :  { %12 = vsyncpa [#allocation5], 0  ;;  %s317_s12 = smov [#allocation3]   ;;  %s318_s14 = smov [#allocation7]  }
   0x4   :  { %s19_s13 = sshll.u32 %s317_s12, 4  ;;  %s29_s15 = sshll.u32 %s318_s14, 4  ;;  %s20_s13 = int_to_ptr.vmem [resolvable:$true] %s19_s13  ;;  %s30_s15 = int_to_ptr.vmem [resolvable:$true] %s29_s15 }
   0x5   :  { %s233_s18 = scalar_lea.hbm %s392_s0, 128 }
   0x6   :  { %p234_p0 = scmp.ne.s32.totalorder %s392_s0, %s233_s18  ;;  %p237_p1 = scmp.lt.u32.totalorder %s233_s18, %s392_s0 }
   0x8   :  { %p239_p2 = pnand %p237_p1, %p234_p0 }
   0xa   :  { %242 = shalt.err (!%p239_p2)
}
   0xb   :  { %s243_s23 = scalar_lea.vmem %s20_s13, 128  ;;  %p248_p4 = scmp.lt.s32.totalorder %s20_s13, %s20_s13 }
   0xc   :  { %p244_p3 = scmp.ne.s32.totalorder %s20_s13, %s243_s23  ;;  %p249_p5 = scmp.lt.s32.totalorder %s243_s23, %s243_s23 }
   0xe   :  { %p250_p6 = por %p249_p5, %p248_p4 }
  0x10   :  { %p251_p7 = pnand %p250_p6, %p244_p3 }
  0x12   :  { %254 = shalt.err (!%p251_p7)
}
  0x13   :  { %22 = dma.hbm_to_vmem [thread:$0]  %s392_s0, 128, %s20_s13, [#allocation4]  }
  0x14   :  { %s255_s28 = scalar_lea.hbm %s393_s1, 128 }
  0x15   :  { %p256_p8 = scmp.ne.s32.totalorder %s393_s1, %s255_s28  ;;  %p259_p9 = scmp.lt.u32.totalorder %s255_s28, %s393_s1 }
  0x17   :  { %p261_p10 = pnand %p259_p9, %p256_p8 }
  0x19   :  { %264 = shalt.err (!%p261_p10)
}
  0x1a   :  { %s265_s6 = scalar_lea.vmem %s30_s15, 128  ;;  %p270_p12 = scmp.lt.s32.totalorder %s30_s15, %s30_s15 }
  0x1b   :  { %p266_p11 = scmp.ne.s32.totalorder %s30_s15, %s265_s6  ;;  %p271_p13 = scmp.lt.s32.totalorder %s265_s6, %s265_s6 }
  0x1d   :  { %p272_p0 = por %p271_p13, %p270_p12 }
  0x1f   :  { %p273_p1 = pnand %p272_p0, %p266_p11 }
  0x21   :  { %276 = shalt.err (!%p273_p1)
}
  0x22   :  { %32 = dma.hbm_to_vmem [thread:$0]  %s393_s1, 128, %s30_s15, [#allocation8]  }
  0x23   :  { %309 = dma.done.wait [#allocation4], 128  }
  0x24   :  { %310 = vsyncadd [#allocation4], 4294967168 }
  0x25   :  { %311 = dma.done.wait [#allocation8], 128  }
  0x26   :  { %312 = vsyncadd [#allocation8], 4294967168  ;;  %v43_v0 = vld [vmem:[#allocation7] sm:$0xff]  ;;  %v56_v1 = vld [vmem:[#allocation3] sm:$0xff]  ;;  %vm319_vm2 = vmmov 1   ;;  %v320_v6 = vmov 0.0  }
  0x27   :  { %vm44_vm0 = vweird.f32 %v43_v0  ;;  %vm57_vm1 = vweird.f32 %v56_v1  ;;  %210 = vmatprep.subr.mxu0 %v320_v6  ;;  %vm321_vm5 = vmmov 0   ;;  %vm137_vm6 = vcmask 64512   ;;  %s322_s1 = smov [#allocation10]  }
  0x28   :  { %vm45_vm3 = vmxor %vm44_vm0, %vm319_vm2  ;;  %212 = vmatprep.mubr.msk.f32.mxu0 %vm321_vm5, %v320_v6  ;;  %vm159_vm7 = vcmask 7168   ;;  %s193_s8 = sshll.u32 %s322_s1, 4  ;;  %s194_s8 = int_to_ptr.vmem [resolvable:$true] %s193_s8 }
  0x29   :  { %v46_v2 = vsel %vm45_vm3, %v43_v0, 0.0  ;;  %vm58_vm4 = vmxor %vm57_vm1, %vm319_vm2  ;;  %s277_s9 = scalar_lea.vmem %s194_s8, 128  ;;  %p282_p3 = scmp.lt.s32.totalorder %s194_s8, %s194_s8 }
  0x2a   :  { %v47_v3 = vmul.f32 %v46_v2, %v46_v2  ;;  %v59_v4 = vsel %vm58_vm4, %v56_v1, 0.0  ;;  %p278_p2 = scmp.ne.s32.totalorder %s194_s8, %s277_s9  ;;  %p283_p4 = scmp.lt.s32.totalorder %s277_s9, %s277_s9 }
  0x2b   :  { %v60_v5 = vmul.f32 %v59_v4, %v59_v4 }
  0x2c   :  { %48 = vadd.xlane.f32.xlu0 %v47_v3  ;;  %p284_p5 = por %p283_p4, %p282_p3 }
  0x2e   :  { %p285_p6 = pnand %p284_p5, %p278_p2 }
  0x30   :  { %61 = vadd.xlane.f32.xlu0 %v60_v5 }
  0xb9   :  { %v49_v7 = vpop.xlane.xlu0 %48 }
  0xba   :  { %v50_v8 = vmax.f32 %v49_v7, 1e-24 }
  0xbc   :  { %225 = vrsqrt.f32 %v50_v8 }
  0xbd   :  { %v62_v9 = vpop.xlane.xlu0 %61 }
  0xbe   :  { %v63_v10 = vmax.f32 %v62_v9, 1e-24 }
  0xc0   :  { %227 = vrsqrt.f32 %v63_v10 }
  0xc6   :  { %v226_v11 = vpop.eup %225 }
  0xc7   :  { %v52_v12 = vmul.f32 %v226_v11, %v46_v2 }
  0xc9   :  { %211 = vmatpush3.xpose.msra.mxu0 %v52_v12 }
  0xca   :  { %v228_v13 = vpop.eup %227 }
  0xcb   :  { %v65_v14 = vmul.f32 %v228_v13, %v59_v4 }
  0xcd   :  { %213 = vmatmul.mubr.f32.vlgmr.msra.gmra.mrb[0].mxu0 %v65_v14  ;;  %v142_v15 = vmul.f32 %v65_v14, %v52_v12 }
  0xcf   :  { %143 = vadd.xlane.f32.xlu0 %v142_v15 }
 0x15c   :  { %v144_v28 = vpop.xlane.xlu0 %143 }
 0x1a0   :  { %v133_v16 = vpop.f32.mrb[0].mxu0 }
 0x1a1   :  { %v214_v17 = vpop.f32.mrb[1].mxu0  ;;  %v145_v18 = vsel %vm137_vm6, %v133_v16, -inf  ;;  %138 = vst.msk [vmem:[#allocation10] sm:$0xff] %vm137_vm6, %v133_v16 }
 0x1a2   :  { %146 = vmax.xlane.f32.xlu1 %v145_v18 }
 0x22f   :  { %v147_v19 = vpop.xlane.xlu1 %146 }
 0x230   :  { %v148_v20 = vsub.f32 %v133_v16, %v147_v19 }
 0x232   :  { %v149_v21 = vmul.f32 1.442695, %v148_v20 }
 0x234   :  { %229 = vpow2.f32 %v149_v21 }
 0x23e   :  { %v230_v22 = vpop.eup %229 }
 0x23f   :  { %v151_v23 = vsel %vm137_vm6, %v230_v22, 0.0 }
 0x240   :  { %152 = vadd.xlane.f32.xlu1 %v151_v23 }
 0x2cd   :  { %v153_v24 = vpop.xlane.xlu1 %152 }
 0x2ce   :  { %231 = vlog2.f32 %v153_v24 }
 0x2d8   :  { %v232_v25 = vpop.eup %231 }
 0x2d9   :  { %v155_v26 = vmul.f32 0.6931472, %v232_v25 }
 0x2db   :  { %v156_v27 = vadd.f32 %v155_v26, %v147_v19 }
 0x2dd   :  { %v158_v29 = vsub.f32 %v156_v27, %v144_v28 }
 0x2df   :  { %v160_v30 = vsel %vm159_vm7, %v158_v29, 0.0 }
 0x2e0   :  { %161 = vadd.xlane.f32.xlu1 %v160_v30 }
 0x2e1   :  { %288 = shalt.err (!%p285_p6)
}
 0x2e2   :  { %s289_s12 = scalar_lea.hbm %s395_s3, 128 }
 0x2e3   :  { %p290_p7 = scmp.ne.s32.totalorder %s395_s3, %s289_s12  ;;  %p293_p8 = scmp.lt.u32.totalorder %s289_s12, %s395_s3 }
 0x2e5   :  { %p295_p9 = pnand %p293_p8, %p290_p7 }
 0x2e7   :  { %298 = shalt.err (!%p295_p9)
}
 0x2e8   :  { %196 = dma.vmem_to_hbm [thread:$0]  %s194_s8, 128, %s395_s3, [#allocation5]  }
 0x2e9   :  { %s299_s23 = scalar_lea.hbm %s394_s2, 16 }
 0x2ea   :  { %p300_p10 = scmp.ne.s32.totalorder %s394_s2, %s299_s23  ;;  %p303_p11 = scmp.lt.u32.totalorder %s299_s23, %s394_s2 }
 0x2ec   :  { %p305_p12 = pnand %p303_p11, %p300_p10 }
 0x36d   :  { %v162_v31 = vpop.xlane.xlu1 %161 }
 0x36e   :  { %v163_v32 = vrot.slane %v162_v31, 4 }
 0x370   :  { %v164_v33 = vadd.f32 %v163_v32, %v162_v31 }
 0x372   :  { %v165_v34 = vrot.slane %v164_v33, 2 }
 0x374   :  { %v166_v35 = vadd.f32 %v165_v34, %v164_v33 }
 0x376   :  { %v167_v36 = vrot.slane %v166_v35, 1 }
 0x378   :  { %v168_v37 = vadd.f32 %v167_v36, %v166_v35 }
 0x37a   :  { %215 = vpush %v168_v37 }
 0x3ab   :  { %s216_s19 = spop %215 }
 0x3ac   :  { %s177_s20 = smul.f32 0.125, %s216_s19 }
 0x3ae   :  { %178 = sst [smem:[#allocation9]] %s177_s20 }
 0x3af   :  { %308 = shalt.err (!%p305_p12)
}
 0x3b0   :  { %s323_s27 = smov [#allocation9]  }
 0x3b1   :  { %186 = dma.smem_to_hbm %s323_s27, 16, %s394_s2, [#allocation6]  }
 0x3b2   :  { %313 = dma.done.wait [#allocation6], 16  }
 0x3b3   :  { %314 = vsyncadd [#allocation6], 4294967280 }
 0x3b4   :  { %315 = dma.done.wait [#allocation5], 128  }
 0x3b5   :  { %316 = vsyncadd [#allocation5], 4294967168 }
 0x3b6   :  { %203 = sfence }
 0x3b7   :  { %204 = vsyncpa [#allocation4], 1 }
 0x3b8   :  { %205 = vsyncpa [#allocation8], 1 }
 0x3b9   :  { %206 = vsyncpa [#allocation5], 1 }
 0x3ba   :  { %207 = vsyncpa [#allocation6], 1 }

</bundles_post_ra>
